<compile_context>
chip_gen: v6e
topology: v6e:2x2x1
jax: 0.10.0
libtpu: 0.0.40
codegen_flags: <defaults>
</compile_context>

<pallas_src>
import jax
import jax.numpy as jnp
from jax.experimental import pallas as pl
from jax.experimental.pallas import tpu as pltpu


def _round_up(x, m):
    return ((x + m - 1) // m) * m


def hamiltonian_kernel(xT_ref, w1_ref, b1_ref, w2_ref, b2_ref, w3_ref, b3_ref, o_ref):
    # Batch lives on the lane axis: activations are (hidden, TM), fully lane-dense.
    xT = xT_ref[...]                                                  # (input_dim, tm)
    h1 = jnp.tanh(
        jnp.dot(w1_ref[...], xT, preferred_element_type=jnp.float32,
                precision=jax.lax.Precision.HIGHEST)
        + b1_ref[...]                                                 # (hidden, 1) bcast over lanes
    )                                                                 # (hidden, tm)
    h2 = jnp.tanh(
        jnp.dot(w2_ref[...], h1, preferred_element_type=jnp.float32,
                precision=jax.lax.Precision.HIGHEST)
        + b2_ref[...]
    )                                                                 # (hidden, tm)
    # Final (hidden -> 1) layer: VPU multiply + sublane (XLU) reduce -> (1, tm),
    # naturally lane-dense, keeps the MXU free of a degenerate N=1 matmul.
    out = jnp.sum(h2 * w3_ref[...], axis=0, keepdims=True) + b3_ref[0]
    o_ref[...] = out.astype(o_ref.dtype)


def hamiltonian_net(state, params, *, block_rows=4096):
    """state: (B, input_dim) float32. Returns (B, 1) float32 = H(q, p)."""
    w1, b1, w2, b2, w3, b3 = params
    B, input_dim = state.shape
    hidden = w1.shape[0]

    # Batch tile: large (multiple of 128 lanes) to amortize per-step pipeline overhead.
    rounded_b = _round_up(B, 128)
    tm = max(128, min(_round_up(block_rows, 128), rounded_b))
    # Keep >= 2 grid steps when B allows it so v7x's two TensorCores both get work.
    if rounded_b >= 256 and pl.cdiv(rounded_b, tm) < 2:
        tm = _round_up(pl.cdiv(B, 2), 128)
    padded_b = pl.cdiv(B, tm) * tm
    grid = (padded_b // tm,)

    # Batch on lanes: stream state^T as (input_dim, tm) blocks (wrapper-side
    # transpose/pad is layout plumbing outside the kernel).
    state_t = state.T
    if padded_b != B:
        state_t = jnp.pad(state_t, ((0, 0), (0, padded_b - B)))

    # Advisory cost estimate so XLA schedules sensibly around this kernel.
    flops = 2 * B * (input_dim * hidden + hidden * hidden + hidden)
    bytes_accessed = 4 * (
        padded_b * input_dim + padded_b
        + w1.size + b1.size + w2.size + b2.size + w3.size + b3.size
    )
    cost = pl.CostEstimate(
        flops=flops, transcendentals=2 * B * hidden, bytes_accessed=bytes_accessed
    )

    def const(arr):
        # Weight/bias blocks: full array, same block every grid step -> VMEM-resident.
        nd = arr.ndim
        return pl.BlockSpec(arr.shape, lambda i, _nd=nd: (0,) * _nd)

    out = pl.pallas_call(
        hamiltonian_kernel,
        out_shape=jax.ShapeDtypeStruct((1, padded_b), jnp.float32),
        grid=grid,
        in_specs=[
            pl.BlockSpec((input_dim, tm), lambda i: (0, i)),    # streamed state^T tiles
            const(w1), const(b1),
            const(w2), const(b2),
            const(w3),
            pl.BlockSpec(memory_space=pltpu.MemorySpace.SMEM),  # b3 scalar in SMEM
        ],
        out_specs=pl.BlockSpec((1, tm), lambda i: (0, i)),      # lane-dense output row
        compiler_params=pltpu.CompilerParams(dimension_semantics=("parallel",)),
        cost_estimate=cost,
    )(state_t, w1, b1, w2, b2, w3, b3)

    return out[0, :B][:, None]


def init_params(key, input_dim, hidden_dim=64):
    """PyTorch nn.Linear init: U(-1/sqrt(fan_in), 1/sqrt(fan_in)).
    Weights kept in PyTorch (out, in) layout so the kernel computes W @ x^T directly
    (batch on lanes). Biases and the last-layer weight are stored as (hidden, 1)
    columns so they broadcast along the lane (batch) axis."""
    ks = jax.random.split(key, 6)

    def layer(kw, kb, fan_in, fan_out):
        bound = 1.0 / (fan_in ** 0.5)
        w = jax.random.uniform(kw, (fan_out, fan_in), jnp.float32, -bound, bound)
        b = jax.random.uniform(kb, (fan_out, 1), jnp.float32, -bound, bound)
        return w, b

    w1, b1 = layer(ks[0], ks[1], input_dim, hidden_dim)       # (H, D), (H, 1)
    w2, b2 = layer(ks[2], ks[3], hidden_dim, hidden_dim)      # (H, H), (H, 1)
    w3, b3 = layer(ks[4], ks[5], hidden_dim, 1)               # (1, H), (1, 1)
    return (w1, b1, w2, b2, w3.T, b3[0])                      # w3 -> (H, 1), b3 -> (1,)


def reference(state, params):
    w1, b1, w2, b2, w3, b3 = params
    hp = jax.lax.Precision.HIGHEST
    h = jnp.tanh(jnp.dot(state, w1.T, precision=hp) + b1[:, 0])
    h = jnp.tanh(jnp.dot(h, w2.T, precision=hp) + b2[:, 0])
    return jnp.dot(h, w3, precision=hp) + b3


if __name__ == "__main__":
    key = jax.random.PRNGKey(0)
    k_x, k_x2, k_p = jax.random.split(key, 3)

    batch, input_dim, hidden_dim = 8, 4, 32  # state = concat(q, p)
    params = init_params(k_p, input_dim, hidden_dim)

    # Case 1: tiny batch (single 128-row tile after padding).
    state = jax.random.normal(k_x, (batch, input_dim), jnp.float32)
    out = jax.block_until_ready(hamiltonian_net(state, params))
    ref = reference(state, params)
    assert out.shape == (batch, 1)
    assert jnp.allclose(out, ref, atol=1e-5, rtol=1e-5), (out, ref)

    # Case 2: ragged batch with >1 grid step (exercises padding + multi-tile path).
    state2 = jax.random.normal(k_x2, (300, input_dim), jnp.float32)
    out2 = jax.block_until_ready(hamiltonian_net(state2, params, block_rows=256))
    ref2 = reference(state2, params)
    assert out2.shape == (300, 1)
    assert jnp.allclose(out2, ref2, atol=1e-5, rtol=1e-5), (out2, ref2)

    print("KERNEL_OK")
</pallas_src>

<mosaic_0001>
module attributes {stable_mosaic.version = 11 : i64} {
  func.func @hamiltonian_kernel(%arg0: i32, %arg1: memref<4x128xf32, #tpu.memory_space<vmem>>, %arg2: memref<32x4xf32, #tpu.memory_space<vmem>>, %arg3: memref<32x1xf32, #tpu.memory_space<vmem>>, %arg4: memref<32x32xf32, #tpu.memory_space<vmem>>, %arg5: memref<32x1xf32, #tpu.memory_space<vmem>>, %arg6: memref<32x1xf32, #tpu.memory_space<vmem>>, %arg7: memref<1xf32, #tpu.memory_space<smem>>, %arg8: memref<1x128xf32, #tpu.memory_space<vmem>>) attributes {dimension_semantics = [#tpu.dimension_semantics<parallel>], iteration_bounds = array<i64: 1>, scalar_prefetch = 0 : i64, scratch_operands = 0 : i64, tpu.core_type = #tpu.core_type<tc>, window_params = [{transform_indices = @transform_0, window_bounds = array<i64: 4, 128>}, {pipeline_mode = #tpu.pipeline_mode<synchronous>, transform_indices = @transform_1, window_bounds = array<i64: 32, 4>}, {pipeline_mode = #tpu.pipeline_mode<synchronous>, transform_indices = @transform_2, window_bounds = array<i64: 32, 1>}, {pipeline_mode = #tpu.pipeline_mode<synchronous>, transform_indices = @transform_3, window_bounds = array<i64: 32, 32>}, {pipeline_mode = #tpu.pipeline_mode<synchronous>, transform_indices = @transform_4, window_bounds = array<i64: 32, 1>}, {pipeline_mode = #tpu.pipeline_mode<synchronous>, transform_indices = @transform_5, window_bounds = array<i64: 32, 1>}, {transform_indices = @transform_6, window_bounds = array<i64: 1>}, {transform_indices = @transform_7, window_bounds = array<i64: 1, 128>}]} {
    %c0 = arith.constant 0 : index
    %c0_0 = arith.constant 0 : index
    %0 = vector.load %arg1[%c0, %c0_0] : memref<4x128xf32, #tpu.memory_space<vmem>>, vector<4x128xf32>
    %c0_1 = arith.constant 0 : index
    %c0_2 = arith.constant 0 : index
    %1 = vector.load %arg2[%c0_1, %c0_2] : memref<32x4xf32, #tpu.memory_space<vmem>>, vector<32x4xf32>
    %cst = arith.constant dense<0.000000e+00> : vector<32x128xf32>
    %2 = tpu.matmul %1, %0, %cst {dimension_numbers = #tpu.dot_dimension_numbers<[1], [0], [0], [1], [0, 0, 1, 1], [], []>, precision = #tpu.contract_precision<fp32>} : vector<32x4xf32>, vector<4x128xf32>, vector<32x128xf32> -> vector<32x128xf32>
    %c0_3 = arith.constant 0 : index
    %c0_4 = arith.constant 0 : index
    %3 = vector.load %arg3[%c0_3, %c0_4] : memref<32x1xf32, #tpu.memory_space<vmem>>, vector<32x1xf32>
    %4 = vector.broadcast %3 : vector<32x1xf32> to vector<32x128xf32>
    %5 = arith.addf %2, %4 : vector<32x128xf32>
    %6 = math.tanh %5 : vector<32x128xf32>
    %c0_5 = arith.constant 0 : index
    %c0_6 = arith.constant 0 : index
    %7 = vector.load %arg4[%c0_5, %c0_6] : memref<32x32xf32, #tpu.memory_space<vmem>>, vector<32x32xf32>
    %cst_7 = arith.constant dense<0.000000e+00> : vector<32x128xf32>
    %8 = tpu.matmul %7, %6, %cst_7 {dimension_numbers = #tpu.dot_dimension_numbers<[1], [0], [0], [1], [0, 0, 1, 1], [], []>, precision = #tpu.contract_precision<fp32>} : vector<32x32xf32>, vector<32x128xf32>, vector<32x128xf32> -> vector<32x128xf32>
    %c0_8 = arith.constant 0 : index
    %c0_9 = arith.constant 0 : index
    %9 = vector.load %arg5[%c0_8, %c0_9] : memref<32x1xf32, #tpu.memory_space<vmem>>, vector<32x1xf32>
    %10 = vector.broadcast %9 : vector<32x1xf32> to vector<32x128xf32>
    %11 = arith.addf %8, %10 : vector<32x128xf32>
    %12 = math.tanh %11 : vector<32x128xf32>
    %c0_10 = arith.constant 0 : index
    %c0_11 = arith.constant 0 : index
    %13 = vector.load %arg6[%c0_10, %c0_11] : memref<32x1xf32, #tpu.memory_space<vmem>>, vector<32x1xf32>
    %14 = vector.broadcast %13 : vector<32x1xf32> to vector<32x128xf32>
    %15 = arith.mulf %12, %14 : vector<32x128xf32>
    %cst_12 = arith.constant dense<0.000000e+00> : vector<128xf32>
    %16 = vector.multi_reduction <add>, %15, %cst_12 [0] : vector<32x128xf32> to vector<128xf32>
    %17 = vector.shape_cast %16 : vector<128xf32> to vector<1x128xf32>
    %c0_13 = arith.constant 0 : index
    %18 = memref.load %arg7[%c0_13] : memref<1xf32, #tpu.memory_space<smem>>
    %19 = vector.broadcast %18 : f32 to vector<1x128xf32>
    %20 = arith.addf %17, %19 : vector<1x128xf32>
    %c0_14 = arith.constant 0 : index
    %c0_15 = arith.constant 0 : index
    %21 = vector.load %arg8[%c0_14, %c0_15] : memref<1x128xf32, #tpu.memory_space<vmem>>, vector<1x128xf32>
    tpu.vector_store %arg8[%c0_14, %c0_15], %20 {strides = array<i32>} : memref<1x128xf32, #tpu.memory_space<vmem>>, vector<1x128xf32>,
    return
  }
  func.func @transform_0(%arg0: i32) -> (i32, i32) {
    %c0_i32 = arith.constant 0 : i32
    %c0_i32_0 = arith.constant 0 : i32
    return %c0_i32, %arg0 : i32, i32
  }
  func.func @transform_1(%arg0: i32) -> (i32, i32) {
    %c0_i32 = arith.constant 0 : i32
    %c0_i32_0 = arith.constant 0 : i32
    %c0_i32_1 = arith.constant 0 : i32
    return %c0_i32, %c0_i32_0 : i32, i32
  }
  func.func @transform_2(%arg0: i32) -> (i32, i32) {
    %c0_i32 = arith.constant 0 : i32
    %c0_i32_0 = arith.constant 0 : i32
    %c0_i32_1 = arith.constant 0 : i32
    return %c0_i32, %c0_i32_0 : i32, i32
  }
  func.func @transform_3(%arg0: i32) -> (i32, i32) {
    %c0_i32 = arith.constant 0 : i32
    %c0_i32_0 = arith.constant 0 : i32
    %c0_i32_1 = arith.constant 0 : i32
    return %c0_i32, %c0_i32_0 : i32, i32
  }
  func.func @transform_4(%arg0: i32) -> (i32, i32) {
    %c0_i32 = arith.constant 0 : i32
    %c0_i32_0 = arith.constant 0 : i32
    %c0_i32_1 = arith.constant 0 : i32
    return %c0_i32, %c0_i32_0 : i32, i32
  }
  func.func @transform_5(%arg0: i32) -> (i32, i32) {
    %c0_i32 = arith.constant 0 : i32
    %c0_i32_0 = arith.constant 0 : i32
    %c0_i32_1 = arith.constant 0 : i32
    return %c0_i32, %c0_i32_0 : i32, i32
  }
  func.func @transform_6(%arg0: i32) -> i32 {
    %c0_i32 = arith.constant 0 : i32
    %c0_i32_0 = arith.constant 0 : i32
    return %c0_i32 : i32
  }
  func.func @transform_7(%arg0: i32) -> (i32, i32) {
    %c0_i32 = arith.constant 0 : i32
    %c0_i32_0 = arith.constant 0 : i32
    return %c0_i32, %arg0 : i32, i32
  }
}

</mosaic_0001>

<bundles_post_ra>
// kernel: tpu_custom_call.1
= control target key start
LH: loop header
LB: loop body
LE: loop exit
PB: predicated region body
PF: predicated region fallthrough
CT: control target
= control target key end

     0   :  { %vm70_vm0 = vcmask 1043456   ;;  %vm57_vm1 = vcmask 31744   ;;  %v1619_v12 = vmov 0   ;;  %s1867_s0 = inlined_call_operand.vmem [shape: f32[4,128], index: 0, kind: input, shape index: {}]   ;;  %s1868_s1 = inlined_call_operand.vmem [shape: f32[32,4], index: 1, kind: input, shape index: {}]   ;;  %s1869_s2 = inlined_call_operand.vmem [shape: f32[32,1], index: 2, kind: input, shape index: {}]   ;;  %s1870_s3 = inlined_call_operand.vmem [shape: f32[32,32], index: 3, kind: input, shape index: {}]   ;;  %s1871_s4 = inlined_call_operand.vmem [shape: f32[32,1], index: 4, kind: input, shape index: {}]   ;;  %s1872_s5 = inlined_call_operand.vmem [shape: f32[32,1], index: 5, kind: input, shape index: {}]   ;;  %s1873_s6 = inlined_call_operand.<no memory space> [shape: f32[1], index: 6, kind: input, shape index: {}]   ;;  %s1874_s7 = inlined_call_operand.hbm [shape: f32[1,128], index: 7, kind: output, shape index: {}]  }
   0x1   :  { %v28_v0 = vld [vmem:[%s1867_s0] sm:$0xf]  ;;  %v30_v2 = vld [vmem:[%s1868_s1 + $0x8] sm:$0xff]  ;;  %v31_v6 = vld [vmem:[%s1868_s1 + $0x10] sm:$0xff]  ;;  %1579 = vset.pattern.permute.xlu0 %v1619_v12  ;;  %1580 = vset.pattern.permute.xlu1 %v1619_v12 }
   0x2   :  { %v29_v1 = vld [vmem:[%s1868_s1] sm:$0xff]  ;;  %v72_v3 = vsel %vm70_vm0, %v28_v0, 0  ;;  %v62_v5 = vsel %vm57_vm1, %v30_v2, 0  ;;  %v32_v7 = vld [vmem:[%s1868_s1 + $0x18] sm:$0xff]  ;;  %v65_v11 = vsel %vm57_vm1, %v31_v6, 0  ;;  %v34_v16 = vld [vmem:[%s1869_s2 + $0x8] sm:$0xff] }
   0x3   :  { %v59_v4 = vsel %vm57_vm1, %v29_v1, 0  ;;  %v1678_v8 = vand.u32 4294901760, %v72_v3  ;;  %v1682_v10 = vand.u32 4294901760, %v62_v5  ;;  %v36_v13 = vld [vmem:[%s1869_s2 + $0x18] sm:$0xff]  ;;  %v1688_v14 = vand.u32 4294901760, %v65_v11  ;;  %v35_v21 = vld [vmem:[%s1869_s2 + $0x10] sm:$0xff]  ;;  %44 = vperm.xlu1 %1580, %v34_v16  }
   0x4   :  { %v1680_v9 = vand.u32 4294901760, %v59_v4  ;;  %v68_v15 = vsel %vm57_vm1, %v32_v7, 0  ;;  %54 = vperm.xlu0 %1579, %v36_v13   ;;  %v33_v27 = vld [vmem:[%s1869_s2] sm:$0xff] }
   0x5   :  { %1445 = vmatprep.subr.mxu0 %v1678_v8  ;;  %v212_v18 = vsub.f32 %v72_v3, %v1678_v8  ;;  %v151_v19 = vsub.f32 %v62_v5, %v1682_v10  ;;  %v1699_v20 = vand.u32 4294901760, %v68_v15  ;;  %v161_v22 = vsub.f32 %v65_v11, %v1688_v14 }
   0x6   :  { %v141_v17 = vsub.f32 %v59_v4, %v1680_v9  ;;  %1455 = vmatprep.mubr.f32.mxu1 %v1680_v9  ;;  %1446 = vmatpush3.msra.mxu0 %v1678_v8 }
   0x7   :  { %v213_v24 = vand.u32 4294901760, %v212_v18  ;;  %v152_v25 = vand.u32 4294901760, %v151_v19  ;;  %1461 = vmatprep.subr.mxu0 %v212_v18  ;;  %v171_v26 = vsub.f32 %v68_v15, %v1699_v20 }
   0x8   :  { %v142_v23 = vand.u32 4294901760, %v141_v17 }
   0x9   :  { %13 = vsyncpa [#allocation4], 0  ;;  %v162_v28 = vand.u32 4294901760, %v161_v22  ;;  %49 = vperm.xlu0 %1579, %v35_v21   ;;  %v214_v30 = vsub.f32 %v212_v18, %v213_v24  ;;  %v153_v31 = vsub.f32 %v151_v19, %v152_v25  ;;  %v172_v32 = vand.u32 4294901760, %v171_v26  ;;  %v657_v33 = vld [vmem:[%s1871_s4] sm:$0xff]  ;;  %39 = vperm.xlu1 %1580, %v33_v27   ;;  %v659_v41 = vld [vmem:[%s1871_s4 + $0x10] sm:$0xff] }
   0xa   :  { %v143_v29 = vsub.f32 %v141_v17, %v142_v23  ;;  %v658_v42 = vld [vmem:[%s1871_s4 + $0x8] sm:$0xff]  ;;  %v1312_v43 = vld [vmem:[%s1872_s5] sm:$0xff]  ;;  %v660_v44 = vld [vmem:[%s1871_s4 + $0x18] sm:$0xff]  ;;  %vm681_vm2 = vcmask 261120   ;;  %s1620_s14 = smov [#allocation3]  }
   0xb   :  { %v163_v34 = vsub.f32 %v161_v22, %v162_v28  ;;  %v215_v36 = vand.u32 4294901760, %v214_v30  ;;  %v154_v37 = vand.u32 4294901760, %v153_v31  ;;  %v173_v38 = vsub.f32 %v171_v26, %v172_v32  ;;  %v1314_v45 = vld [vmem:[%s1872_s5 + $0x10] sm:$0xff]  ;;  %v1313_v46 = vld [vmem:[%s1872_s5 + $0x8] sm:$0xff]  ;;  %v1315_v47 = vld [vmem:[%s1872_s5 + $0x18] sm:$0xff]  ;;  %s1359_s15 = sshll.u32 %s1620_s14, 4  ;;  %s1360_s15 = int_to_ptr.vmem [resolvable:$true] %s1359_s15 }
   0xc   :  { %v144_v35 = vand.u32 4294901760, %v143_v29  ;;  %v653_v48 = vld [vmem:[%s1870_s3] sm:$0xff]  ;;  %s1597_s16 = scalar_lea.vmem %s1360_s15, 16  ;;  %s1601_s17 = scalar_lea.vmem %s1360_s15, 32 }
   0xd   :  { %v164_v39 = vand.u32 4294901760, %v163_v34  ;;  %663 = vperm.xlu0 %1579, %v657_v33   ;;  %1453 = vmatprep.subr.mxu1 %v215_v36  ;;  %v174_v40 = vand.u32 4294901760, %v173_v38  ;;  %v683_v49 = vsel %vm681_vm2, %v653_v48, 0  ;;  %p1598_p0 = scmp.ne.s32.totalorder %s1360_s15, %s1597_s16  ;;  %p1602_p1 = scmp.lt.s32.totalorder %s1360_s15, %s1360_s15 }
   0xe   :  { %1447 = vmatprep.mubr.f32.mxu0 %v144_v35  ;;  %1454 = vmatpush3.msra.mxu1 %v215_v36  ;;  %v1753_v50 = vand.u32 4294901760, %v683_v49  ;;  %p1603_p2 = scmp.lt.s32.totalorder %s1601_s17, %s1597_s16 }
   0xf   :  { %1448 = vmatmul.mubr.f32.vlgmr.msra.gmra.mxu0 %v154_v37  ;;  %1456 = vmatmul.mubr.f32.vlgmr.msra.gmra.mxu1 %v1682_v10 }
  0x10   :  { %1462 = vmatpush3.msra.mxu0 %v212_v18  ;;  %1469 = vmatprep.subr.mxu1 %v1678_v8  ;;  %v1756_v51 = vsub.f32 %v683_v49, %v1753_v50  ;;  %p1604_p3 = por %p1603_p2, %p1602_p1 }
  0x11   :  { %1450 = vmatprep.mubr.f32.mxu0 %v164_v39  ;;  %1470 = vmatpush3.msra.mxu1 %v1678_v8 }
  0x12   :  { %1458 = vmatprep.mubr.f32.mxu1 %v1688_v14  ;;  %1477 = vmatprep.subr.mxu0 %v213_v24  ;;  %v765_v52 = vand.u32 4294901760, %v1756_v51  ;;  %p1605_p4 = pnand %p1604_p3, %p1598_p0 }
  0x13   :  { %1451 = vmatmul.mubr.f32.gmra.mxu0 %v174_v40  ;;  %1459 = vmatmul.mubr.f32.gmra.mxu1 %v1699_v20 }
  0x14   :  { %1463 = vmatprep.mubr.f32.mxu0 %v141_v17  ;;  %1471 = vmatprep.mubr.f32.mxu1 %v142_v23  ;;  %v766_v53 = vsub.f32 %v1756_v51, %v765_v52 }
  0x15   :  { %1485 = vmatprep.subr.mxu1 %v1678_v8  ;;  %673 = vperm.xlu0 %1579, %v659_v41  }
  0x16   :  { %668 = vperm.xlu1 %1580, %v658_v42   ;;  %v767_v54 = vand.u32 4294901760, %v766_v53  ;;  %v654_v42 = vld [vmem:[%s1870_s3 + $0x8] sm:$0xff] }
  0x17   :  { %1464 = vmatmul.mubr.f32.vlgmr.msra.gmra.mxu0 %v151_v19  ;;  %1472 = vmatmul.mubr.f32.vlgmr.msra.gmra.mxu1 %v152_v25 }
  0x18   :  { %1478 = vmatpush3.msra.mxu0 %v213_v24  ;;  %1466 = vmatprep.mubr.f32.mxu0 %v161_v22 }
  0x19   :  { %1486 = vmatpush3.msra.mxu1 %v1678_v8  ;;  %1474 = vmatprep.mubr.f32.mxu1 %v162_v28 }
  0x1a   :  { %1318 = vperm.xlu0 %1579, %v1312_v43   ;;  %678 = vperm.xlu1 %1580, %v660_v44   ;;  %v686_v44 = vsel %vm681_vm2, %v654_v42, 0 }
  0x1b   :  { %1467 = vmatmul.mubr.f32.gmra.mxu0 %v171_v26  ;;  %1475 = vmatmul.mubr.f32.gmra.mxu1 %v172_v32 }
  0x1c   :  { %1479 = vmatprep.mubr.f32.mxu0 %v1680_v9  ;;  %1487 = vmatprep.mubr.f32.mxu1 %v1680_v9 }
  0x1e   :  { %1328 = vperm.xlu0 %1579, %v1314_v45   ;;  %1323 = vperm.xlu1 %1580, %v1313_v46   ;;  %v655_v45 = vld [vmem:[%s1870_s3 + $0x10] sm:$0xff]  ;;  %v656_v46 = vld [vmem:[%s1870_s3 + $0x18] sm:$0xff] }
  0x1f   :  { %1480 = vmatmul.mubr.f32.vlgmr.msra.gmra.mxu0 %v1682_v10  ;;  %1488 = vmatmul.mubr.f32.vlgmr.msra.gmra.mxu1 %v1682_v10  ;;  %v689_v48 = vsel %vm681_vm2, %v655_v45, 0  ;;  %v692_v49 = vsel %vm681_vm2, %v656_v46, 0 }
  0x20   :  { %1482 = vmatprep.mubr.f32.mxu0 %v1688_v14  ;;  %1490 = vmatprep.mubr.f32.mxu1 %v1688_v14  ;;  %v1777_v53 = vand.u32 4294901760, %v689_v48 }
  0x22   :  { %1333 = vperm.xlu1 %1580, %v1315_v47   ;;  %v1773_v47 = vand.u32 4294901760, %v686_v44 }
  0x23   :  { %1483 = vmatmul.mubr.f32.gmra.mxu0 %v1699_v20  ;;  %1491 = vmatmul.mubr.f32.gmra.mxu1 %v1699_v20 }
  0x24   :  { %1515 = vmatprep.mubr.f32.mxu1 %v1753_v50  ;;  %1501 = vmatprep.mubr.f32.mxu0 %v767_v54  ;;  %v1780_v54 = vsub.f32 %v686_v44, %v1773_v47 }
  0x7e   :  { %v45_v55 = vpop.permute.xlu1 %44 }
  0x7f   :  { %v55_v60 = vpop.permute.xlu0 %54 }
  0x84   :  { %v40_v0 = vpop.permute.xlu1 %39  ;;  %v50_v8 = vpop.permute.xlu0 %49 }
  0xcf   :  { %v1449_v56 = vpop.f32.mrf.mxu0  ;;  %v1457_v57 = vpop.f32.mrf.mxu1 }
  0xd0   :  { %v157_v62 = vadd.f32 %v1449_v56, %v45_v55  ;;  %v1782_v56 = vand.u32 4294901760, %v692_v49 }
  0xd1   :  { %v146_v58 = vpop.f32.mrf.mxu0  ;;  %v252_v59 = vpop.f32.mrf.mxu1 }
  0xd2   :  { %v147_v2 = vadd.f32 %v146_v58, %v40_v0  ;;  %v259_v5 = vadd.f32 %v1457_v57, %v157_v62 }
  0xd3   :  { %v1452_v61 = vpop.f32.mrf.mxu0  ;;  %v1460_v63 = vpop.f32.mrf.mxu1 }
  0xd4   :  { %v177_v6 = vadd.f32 %v1452_v61, %v55_v60  ;;  %v253_v10 = vadd.f32 %v252_v59, %v147_v2  ;;  %v1787_v59 = vsub.f32 %v689_v48, %v1777_v53  ;;  %v775_v60 = vand.u32 4294901760, %v1780_v54 }
  0xd5   :  { %v166_v1 = vpop.f32.mrf.mxu0  ;;  %v264_v3 = vpop.f32.mrf.mxu1 }
  0xd6   :  { %v167_v11 = vadd.f32 %v166_v1, %v50_v8  ;;  %v271_v15 = vadd.f32 %v1460_v63, %v177_v6  ;;  %v1793_v63 = vsub.f32 %v692_v49, %v1782_v56  ;;  %v785_v2 = vand.u32 4294901760, %v1787_v59 }
  0xd7   :  { %v1465_v4 = vpop.f32.mrf.mxu0  ;;  %v1473_v7 = vpop.f32.mrf.mxu1 }
  0xd8   :  { %v352_v12 = vadd.f32 %v1465_v4, %v259_v5  ;;  %v265_v19 = vadd.f32 %v264_v3, %v167_v11  ;;  %v776_v5 = vsub.f32 %v1780_v54, %v775_v60  ;;  %v786_v11 = vsub.f32 %v1787_v59, %v785_v2 }
  0xd9   :  { %v344_v9 = vpop.f32.mrf.mxu0  ;;  %v439_v13 = vpop.f32.mrf.mxu1 }
  0xda   :  { %v345_v16 = vadd.f32 %v344_v9, %v253_v10  ;;  %v448_v20 = vadd.f32 %v1473_v7, %v352_v12  ;;  %v795_v7 = vand.u32 4294901760, %v1793_v63 }
  0xdb   :  { %v1468_v14 = vpop.f32.mrf.mxu0  ;;  %v1476_v17 = vpop.f32.mrf.mxu1 }
  0xdc   :  { %v366_v21 = vadd.f32 %v1468_v14, %v271_v15  ;;  %v440_v24 = vadd.f32 %v439_v13, %v345_v16  ;;  %v777_v13 = vand.u32 4294901760, %v776_v5  ;;  %v796_v16 = vsub.f32 %v1793_v63, %v795_v7 }
  0xdd   :  { %v358_v18 = vpop.f32.mrf.mxu0  ;;  %v455_v22 = vpop.f32.mrf.mxu1 }
  0xde   :  { %v359_v25 = vadd.f32 %v358_v18, %v265_v19  ;;  %v464_v29 = vadd.f32 %v1476_v17, %v366_v21 }
  0xdf   :  { %v1481_v23 = vpop.f32.mrf.mxu0  ;;  %v1489_v27 = vpop.f32.mrf.mxu1 }
  0xe0   :  { %v544_v26 = vadd.f32 %v1481_v23, %v448_v20  ;;  %v456_v34 = vadd.f32 %v455_v22, %v359_v25  ;;  %v787_v20 = vand.u32 4294901760, %v786_v11  ;;  %v797_v23 = vand.u32 4294901760, %v796_v16 }
  0xe1   :  { %v537_v28 = vpop.f32.mrf.mxu0  ;;  %v627_v32 = vpop.f32.mrf.mxu1 }
  0xe2   :  { %v634_v30 = vadd.f32 %v1489_v27, %v544_v26  ;;  %v538_v31 = vadd.f32 %v537_v28, %v440_v24 }
  0xe3   :  { %v1484_v33 = vpop.f32.mrf.mxu0  ;;  %v1492_v37 = vpop.f32.mrf.mxu1 }
  0xe4   :  { %1581 = vtanh.f32 %v634_v30  ;;  %v628_v35 = vadd.f32 %v627_v32, %v538_v31  ;;  %v556_v36 = vadd.f32 %v1484_v33, %v464_v29  ;;  %v669_v32 = vpop.permute.xlu1 %668 }
  0xe5   :  { %v549_v38 = vpop.f32.mrf.mxu0  ;;  %v639_v41 = vpop.f32.mrf.mxu1 }
  0xe6   :  { %1583 = vtanh.f32 %v628_v35  ;;  %v646_v39 = vadd.f32 %v1492_v37, %v556_v36  ;;  %v550_v40 = vadd.f32 %v549_v38, %v456_v34  ;;  %v664_v35 = vpop.permute.xlu0 %663 }
  0xe8   :  { %1585 = vtanh.f32 %v646_v39  ;;  %v640_v43 = vadd.f32 %v639_v41, %v550_v40  ;;  %v679_v40 = vpop.permute.xlu1 %678 }
  0xea   :  { %1587 = vtanh.f32 %v640_v43  ;;  %v674_v45 = vpop.permute.xlu0 %673 }
  0xf1   :  { %v1582_v55 = vpop.eup %1581 }
  0xf2   :  { %v1784_v58 = vand.u32 4294901760, %v1582_v55 }
  0xf3   :  { %v1584_v57 = vpop.eup %1583 }
  0xf4   :  { %v1790_v62 = vand.u32 4294901760, %v1584_v57  ;;  %v843_v3 = vsub.f32 %v1582_v55, %v1784_v58 }
  0xf5   :  { %v1586_v61 = vpop.eup %1585 }
  0xf6   :  { %v1795_v0 = vand.u32 4294901760, %v1586_v61  ;;  %v850_v8 = vsub.f32 %v1584_v57, %v1790_v62  ;;  %v844_v12 = vand.u32 4294901760, %v843_v3 }
  0xf7   :  { %v1588_v1 = vpop.eup %1587 }
  0xf8   :  { %v1799_v4 = vand.u32 4294901760, %v1588_v1  ;;  %1493 = vmatprep.subr.mxu0 %v1795_v0  ;;  %v829_v6 = vsub.f32 %v1586_v61, %v1795_v0  ;;  %v851_v17 = vand.u32 4294901760, %v850_v8  ;;  %v845_v21 = vsub.f32 %v843_v3, %v844_v12 }
  0xf9   :  { %1494 = vmatpush3.msra.mxu0 %v1795_v0 }
  0xfa   :  { %1495 = vmatprep.subr.mxu0 %v1799_v4  ;;  %v830_v9 = vand.u32 4294901760, %v829_v6  ;;  %v836_v10 = vsub.f32 %v1588_v1, %v1799_v4  ;;  %v852_v24 = vsub.f32 %v850_v8, %v851_v17  ;;  %v846_v25 = vand.u32 4294901760, %v845_v21 }
  0xfb   :  { %1496 = vmatpush3.msra.mxu0 %v1799_v4 }
  0xfc   :  { %1497 = vmatprep.subr.mxu0 %v1784_v58  ;;  %v831_v14 = vsub.f32 %v829_v6, %v830_v9  ;;  %v837_v15 = vand.u32 4294901760, %v836_v10  ;;  %v853_v26 = vand.u32 4294901760, %v852_v24 }
  0xfd   :  { %1498 = vmatpush3.msra.mxu0 %v1784_v58 }
  0xfe   :  { %1499 = vmatprep.subr.mxu0 %v1790_v62  ;;  %v832_v18 = vand.u32 4294901760, %v831_v14  ;;  %v838_v19 = vsub.f32 %v836_v10, %v837_v15 }
  0xff   :  { %1500 = vmatpush3.msra.mxu0 %v1790_v62 }
 0x100   :  { %1502 = vmatmul.mubr.f32.vlgmr.msra.gmra.mxu0 %v777_v13  ;;  %1507 = vmatprep.subr.mxu1 %v832_v18  ;;  %v839_v22 = vand.u32 4294901760, %v838_v19 }
 0x101   :  { %1521 = vmatprep.subr.mxu0 %v829_v6  ;;  %1508 = vmatpush3.msra.mxu1 %v832_v18  ;;  %v1324_v18 = vpop.permute.xlu1 %1323 }
 0x102   :  { %1522 = vmatpush3.msra.mxu0 %v829_v6  ;;  %1509 = vmatprep.subr.mxu1 %v839_v22 }
 0x103   :  { %1523 = vmatprep.subr.mxu0 %v836_v10  ;;  %1504 = vmatprep.mubr.f32.mxu0 %v787_v20 }
 0x104   :  { %1510 = vmatpush3.msra.mxu1 %v839_v22  ;;  %1524 = vmatpush3.msra.mxu0 %v836_v10 }
 0x105   :  { %1505 = vmatmul.mubr.f32.gmra.mxu0 %v797_v23  ;;  %1511 = vmatprep.subr.mxu1 %v846_v25 }
 0x106   :  { %1525 = vmatprep.subr.mxu0 %v843_v3  ;;  %1512 = vmatpush3.msra.mxu1 %v846_v25 }
 0x107   :  { %1526 = vmatpush3.msra.mxu0 %v843_v3  ;;  %1513 = vmatprep.subr.mxu1 %v853_v26 }
 0x108   :  { %1527 = vmatprep.subr.mxu0 %v850_v8  ;;  %1514 = vmatpush3.msra.mxu1 %v853_v26  ;;  %v1334_v26 = vpop.permute.xlu1 %1333 }
 0x109   :  { %1528 = vmatpush3.msra.mxu0 %v850_v8  ;;  %1516 = vmatmul.mubr.f32.vlgmr.msra.gmra.mxu1 %v1773_v47 }
 0x10a   :  { %1529 = vmatprep.mubr.f32.mxu0 %v1756_v51  ;;  %1535 = vmatprep.subr.mxu1 %v1795_v0 }
 0x10b   :  { %1549 = vmatprep.subr.mxu0 %v830_v9  ;;  %1530 = vmatmul.mubr.f32.vlgmr.msra.gmra.mxu0 %v1780_v54 }
 0x10c   :  { %1536 = vmatpush3.msra.mxu1 %v1795_v0  ;;  %1550 = vmatpush3.msra.mxu0 %v830_v9 }
 0x10d   :  { %1537 = vmatprep.subr.mxu1 %v1799_v4  ;;  %1551 = vmatprep.subr.mxu0 %v837_v15 }
 0x10e   :  { %1518 = vmatprep.mubr.f32.mxu1 %v1777_v53  ;;  %1538 = vmatpush3.msra.mxu1 %v1799_v4 }
 0x10f   :  { %1552 = vmatpush3.msra.mxu0 %v837_v15  ;;  %1519 = vmatmul.mubr.f32.gmra.mxu1 %v1782_v56  ;;  %v1319_v15 = vpop.permute.xlu0 %1318 }
 0x110   :  { %1539 = vmatprep.subr.mxu1 %v1784_v58  ;;  %1553 = vmatprep.subr.mxu0 %v844_v12 }
 0x111   :  { %1532 = vmatprep.mubr.f32.mxu0 %v1787_v59  ;;  %1540 = vmatpush3.msra.mxu1 %v1784_v58 }
 0x112   :  { %1554 = vmatpush3.msra.mxu0 %v844_v12  ;;  %1541 = vmatprep.subr.mxu1 %v1790_v62 }
 0x113   :  { %1533 = vmatmul.mubr.f32.gmra.mxu0 %v1793_v63  ;;  %1555 = vmatprep.subr.mxu0 %v851_v17  ;;  %v1329_v23 = vpop.permute.xlu0 %1328 }
 0x114   :  { %1542 = vmatpush3.msra.mxu1 %v1790_v62  ;;  %1543 = vmatprep.mubr.f32.mxu1 %v765_v52 }
 0x115   :  { %1556 = vmatpush3.msra.mxu0 %v851_v17  ;;  %1544 = vmatmul.mubr.f32.vlgmr.msra.gmra.mxu1 %v775_v60 }
 0x116   :  { %1563 = vmatprep.subr.mxu1 %v1795_v0  ;;  %1557 = vmatprep.mubr.f32.mxu0 %v1753_v50 }
 0x117   :  { %1564 = vmatpush3.msra.mxu1 %v1795_v0  ;;  %1558 = vmatmul.mubr.f32.vlgmr.msra.gmra.mxu0 %v1773_v47 }
 0x118   :  { %1565 = vmatprep.subr.mxu1 %v1799_v4  ;;  %1546 = vmatprep.mubr.f32.mxu1 %v785_v2 }
 0x119   :  { %1566 = vmatpush3.msra.mxu1 %v1799_v4  ;;  %1560 = vmatprep.mubr.f32.mxu0 %v1777_v53 }
 0x11a   :  { %1547 = vmatmul.mubr.f32.gmra.mxu1 %v795_v7  ;;  %1567 = vmatprep.subr.mxu1 %v1784_v58 }
 0x11b   :  { %1568 = vmatpush3.msra.mxu1 %v1784_v58  ;;  %1561 = vmatmul.mubr.f32.gmra.mxu0 %v1782_v56 }
 0x11c   :  { %1569 = vmatprep.subr.mxu1 %v1790_v62  ;;  %1571 = vmatprep.mubr.f32.mxu1 %v1753_v50 }
 0x11d   :  { %1570 = vmatpush3.msra.mxu1 %v1790_v62 }
 0x11e   :  { %1572 = vmatmul.mubr.f32.vlgmr.msra.gmra.mxu1 %v1773_v47 }
 0x11f   :  { %1574 = vmatprep.mubr.f32.mxu1 %v1777_v53 }
 0x122   :  { %1575 = vmatmul.mubr.f32.gmra.mxu1 %v1782_v56 }
 0x1c0   :  { %v1503_v51 = vpop.f32.mrf.mxu0 }
 0x1c1   :  { %v780_v50 = vadd.f32 %v1503_v51, %v669_v32 }
 0x1c2   :  { %v769_v52 = vpop.f32.mrf.mxu0 }
 0x1c3   :  { %v770_v37 = vadd.f32 %v769_v52, %v664_v35 }
 0x1c5   :  { %v1506_v27 = vpop.f32.mrf.mxu0 }
 0x1c6   :  { %v800_v41 = vadd.f32 %v1506_v27, %v679_v40 }
 0x1c7   :  { %v789_v28 = vpop.f32.mrf.mxu0 }
 0x1c8   :  { %v790_v46 = vadd.f32 %v789_v28, %v674_v45 }
 0x1c9   :  { %v1517_v29 = vpop.f32.mrf.mxu1 }
 0x1ca   :  { %v897_v38 = vadd.f32 %v1517_v29, %v780_v50 }
 0x1cb   :  { %v890_v30 = vpop.f32.mrf.mxu1  ;;  %v1531_v31 = vpop.f32.mrf.mxu0 }
 0x1cc   :  { %v891_v42 = vadd.f32 %v890_v30, %v770_v37  ;;  %v996_v47 = vadd.f32 %v1531_v31, %v897_v38 }
 0x1cd   :  { %v988_v34 = vpop.f32.mrf.mxu0 }
 0x1ce   :  { %v989_v54 = vadd.f32 %v988_v34, %v891_v42 }
 0x1cf   :  { %v1520_v33 = vpop.f32.mrf.mxu1 }
 0x1d0   :  { %v909_v48 = vadd.f32 %v1520_v33, %v800_v41  ;;  %v1350_v33 = vstv %s1873_s6 }
 0x1d1   :  { %v902_v36 = vpop.f32.mrf.mxu1 }
 0x1d2   :  { %v903_v55 = vadd.f32 %v902_v36, %v790_v46 }
 0x1d3   :  { %v1534_v39 = vpop.f32.mrf.mxu0 }
 0x1d4   :  { %v1010_v59 = vadd.f32 %v1534_v39, %v909_v48 }
 0x1d5   :  { %v1002_v43 = vpop.f32.mrf.mxu0  ;;  %v1545_v44 = vpop.f32.mrf.mxu1 }
 0x1d6   :  { %v1095_v56 = vadd.f32 %v1545_v44, %v996_v47  ;;  %v1003_v63 = vadd.f32 %v1002_v43, %v903_v55 }
 0x1d7   :  { %v1086_v49 = vpop.f32.mrf.mxu1  ;;  %v1559_v53 = vpop.f32.mrf.mxu0 }
 0x1d8   :  { %v1087_v60 = vadd.f32 %v1086_v49, %v989_v54  ;;  %v1200_v0 = vadd.f32 %v1559_v53, %v1095_v56 }
 0x1d9   :  { %v1193_v57 = vpop.f32.mrf.mxu0 }
 0x1da   :  { %v1548_v58 = vpop.f32.mrf.mxu1  ;;  %v1194_v3 = vadd.f32 %v1193_v57, %v1087_v60 }
 0x1db   :  { %v1562_v62 = vpop.f32.mrf.mxu0  ;;  %v1111_v1 = vadd.f32 %v1548_v58, %v1010_v59 }
 0x1dc   :  { %v1102_v61 = vpop.f32.mrf.mxu1 }
 0x1dd   :  { %v1103_v4 = vadd.f32 %v1102_v61, %v1003_v63  ;;  %v1205_v6 = vpop.f32.mrf.mxu0  ;;  %v1212_v8 = vadd.f32 %v1562_v62, %v1111_v1 }
 0x1de   :  { %v1573_v2 = vpop.f32.mrf.mxu1 }
 0x1df   :  { %v1293_v5 = vadd.f32 %v1573_v2, %v1200_v0  ;;  %v1206_v11 = vadd.f32 %v1205_v6, %v1103_v4 }
 0x1e0   :  { %v1286_v7 = vpop.f32.mrf.mxu1 }
 0x1e1   :  { %v1287_v9 = vadd.f32 %v1286_v7, %v1194_v3  ;;  %1589 = vtanh.f32 %v1293_v5 }
 0x1e2   :  { %v1576_v10 = vpop.f32.mrf.mxu1 }
 0x1e3   :  { %1591 = vtanh.f32 %v1287_v9  ;;  %v1305_v12 = vadd.f32 %v1576_v10, %v1212_v8 }
 0x1e4   :  { %v1298_v13 = vpop.f32.mrf.mxu1 }
 0x1e5   :  { %v1299_v14 = vadd.f32 %v1298_v13, %v1206_v11  ;;  %1593 = vtanh.f32 %v1305_v12 }
 0x1e7   :  { %1595 = vtanh.f32 %v1299_v14 }
 0x1ee   :  { %v1590_v16 = vpop.eup %1589 }
 0x1ef   :  { %v1337_v21 = vmul.f32 %v1590_v16, %v1324_v18 }
 0x1f0   :  { %v1592_v17 = vpop.eup %1591 }
 0x1f1   :  { %v1336_v19 = vmul.f32 %v1592_v17, %v1319_v15 }
 0x1f2   :  { %v1594_v20 = vpop.eup %1593 }
 0x1f3   :  { %v1340_v25 = vadd.f32 %v1337_v21, %v1336_v19  ;;  %v1339_v51 = vmul.f32 %v1594_v20, %v1334_v26 }
 0x1f4   :  { %v1596_v22 = vpop.eup %1595 }
 0x1f5   :  { %v1338_v24 = vmul.f32 %v1596_v22, %v1329_v23 }
 0x1f7   :  { %v1341_v52 = vadd.f32 %v1340_v25, %v1338_v24 }
 0x1f9   :  { %v1342_v27 = vadd.f32 %v1341_v52, %v1339_v51 }
 0x1fb   :  { %v1343_v28 = vrot.slane %v1342_v27, 4 }
 0x1fd   :  { %v1344_v29 = vadd.f32 %v1343_v28, %v1342_v27 }
 0x1ff   :  { %v1345_v30 = vrot.slane %v1344_v29, 2 }
 0x201   :  { %v1346_v31 = vadd.f32 %v1345_v30, %v1344_v29 }
 0x203   :  { %v1347_v32 = vrot.slane %v1346_v31, 1 }
 0x205   :  { %v1348_v34 = vadd.f32 %v1347_v32, %v1346_v31 }
 0x207   :  { %v1351_v35 = vadd.f32 %v1350_v33, %v1348_v34 }
 0x209   :  { %1352 = vst [vmem:[#allocation3] sm:$0x1] %v1351_v35 }
 0x20a   :  { %1608 = shalt.err (!%p1605_p4)
}
 0x20b   :  { %1362 = dma.vmem_to_hbm [thread:$0]  %s1360_s15, 16, %s1874_s7, [#allocation4]  }
 0x20c   :  { %1617 = dma.done.wait [#allocation4], 16  }
 0x20d   :  { %1618 = vsyncadd [#allocation4], 4294967280 }
 0x20e   :  { %1366 = vsyncpa [#allocation4], 1 }

</bundles_post_ra>
